<compile_context>
chip_gen: v7x
topology: tpu7x:2x2x1
jax: 0.10.0
libtpu: 0.0.40
codegen_flags: <defaults>
</compile_context>

<pallas_src>
import jax
import jax.numpy as jnp
from jax.experimental import pallas as pl
from jax.experimental.pallas import tpu as pltpu

# Goal.size() is not available in this synthetic setting; pick a small size.
GOAL_SIZE = 9                  # TODO(synk): real Goal.size() unknown; using 9
IN_DIM = GOAL_SIZE - 1         # "all_but_cum_reward"
HIDDEN_DIM = 128
EMBED_DIM = 32

# Batch-tile target for large (rollout) batches. Sweep 1024/2048/4096;
# 2048 keeps per-call VMEM ~6 MiB (safe on v7x's 64 MiB) while cutting grid
# steps 4x vs the previous 512.
MAX_TILE_B = 2048


def _mlp_kernel(x_ref, w1_ref, b1_ref, w2_ref, b2_ref, out_ref):
    """Two-layer MLP relu(relu(x@W1+b1)@W2+b2) on one batch tile.

    x_ref:  (TB, IN_DIM)          f32  (pipelined per grid step)
    w1_ref: (IN_DIM, HIDDEN_DIM)  f32  (resident across grid steps)
    b1_ref: (1, HIDDEN_DIM)       f32  (resident)
    w2_ref: (HIDDEN_DIM, EMBED)   f32  (resident)
    b2_ref: (1, EMBED)            f32  (resident)
    out_ref:(TB, EMBED)           f32  (pipelined per grid step)
    """
    h = jnp.dot(x_ref[...], w1_ref[...], preferred_element_type=jnp.float32)
    h = jnp.maximum(h + b1_ref[...], 0.0)
    o = jnp.dot(h, w2_ref[...], preferred_element_type=jnp.float32)
    out_ref[...] = jnp.maximum(o + b2_ref[...], 0.0).astype(out_ref.dtype)


def ignore_reward_goal_embedder(x, w1, b1, w2, b2, *, max_tile_b=MAX_TILE_B):
    """x: (batch, IN_DIM) float32 -> (batch, EMBED_DIM) float32."""
    batch, in_dim = x.shape
    hidden_dim = w1.shape[1]
    embed_dim = w2.shape[1]

    # Accept 1-D (PyTorch-style) or (1, dim) biases.
    b1 = jnp.asarray(b1, jnp.float32).reshape(1, hidden_dim)
    b2 = jnp.asarray(b2, jnp.float32).reshape(1, embed_dim)
    x = x.astype(jnp.float32)
    w1 = w1.astype(jnp.float32)
    w2 = w2.astype(jnp.float32)

    # Batch tile selection (no padding: Pallas clips the ragged last block).
    if batch <= 8:
        # Single block equal to the full array dims (satisfies the (8,128)
        # BlockSpec rule without padding).
        tile_b = batch
    elif batch <= max_tile_b:
        # Two tiles so v7x's 2 TensorCores both get work; round to the
        # 8-row sublane granule.
        tile_b = ((pl.cdiv(batch, 2) + 7) // 8) * 8
    else:
        tile_b = max_tile_b
    grid = (pl.cdiv(batch, tile_b),)

    flops = 2 * batch * (in_dim * hidden_dim + hidden_dim * embed_dim)
    bytes_accessed = (
        batch * in_dim * 4                 # x (f32)
        + batch * embed_dim * 4            # out (f32)
        + in_dim * hidden_dim * 4          # w1 (f32)
        + hidden_dim * embed_dim * 4       # w2 (f32)
        + (hidden_dim + embed_dim) * 4     # biases (f32)
    )

    out = pl.pallas_call(
        _mlp_kernel,
        out_shape=jax.ShapeDtypeStruct((batch, embed_dim), jnp.float32),
        grid=grid,
        in_specs=[
            pl.BlockSpec((tile_b, in_dim), lambda i: (i, 0)),         # x tile
            pl.BlockSpec((in_dim, hidden_dim), lambda i: (0, 0)),     # w1 (resident)
            pl.BlockSpec((1, hidden_dim), lambda i: (0, 0)),          # b1 (resident)
            pl.BlockSpec((hidden_dim, embed_dim), lambda i: (0, 0)),  # w2 (resident)
            pl.BlockSpec((1, embed_dim), lambda i: (0, 0)),           # b2 (resident)
        ],
        out_specs=pl.BlockSpec((tile_b, embed_dim), lambda i: (i, 0)),
        compiler_params=pltpu.CompilerParams(
            dimension_semantics=("parallel",),   # shard batch across v7x's 2 TCs
        ),
        cost_estimate=pl.CostEstimate(
            flops=flops, transcendentals=0, bytes_accessed=bytes_accessed),
    )(x, w1, b1, w2, b2)

    return out


def _reference(x, w1, b1, w2, b2):
    h = jnp.maximum(x @ w1 + b1.reshape(1, -1), 0.0)
    return jnp.maximum(h @ w2 + b2.reshape(1, -1), 0.0)


if __name__ == "__main__":
    key = jax.random.PRNGKey(0)
    k_x, k_w1, k_b1, k_w2, k_b2 = jax.random.split(key, 5)

    batch = 2
    # Deterministic synthetic parameters (not a checkpoint load); biases are
    # 1-D like PyTorch nn.Linear to exercise the wrapper reshape.
    w1 = jax.random.normal(k_w1, (IN_DIM, HIDDEN_DIM), jnp.float32) * 0.1
    b1 = jax.random.normal(k_b1, (HIDDEN_DIM,), jnp.float32) * 0.1
    w2 = jax.random.normal(k_w2, (HIDDEN_DIM, EMBED_DIM), jnp.float32) * 0.1
    b2 = jax.random.normal(k_b2, (EMBED_DIM,), jnp.float32) * 0.1

    # Synthetic batch of goal vectors (cum_reward already stripped).
    x = jax.random.normal(k_x, (batch, IN_DIM), jnp.float32)

    out = ignore_reward_goal_embedder(x, w1, b1, w2, b2)
    out = jax.block_until_ready(out)

    ref = _reference(x, w1, b1, w2, b2)
    assert out.shape == (batch, EMBED_DIM)
    # Default-precision MXU matmuls in both kernel and reference; small slack.
    assert jnp.allclose(out, ref, atol=1e-2, rtol=1e-2), (
        float(jnp.max(jnp.abs(out - ref))))

    print("KERNEL_OK")
</pallas_src>

<mosaic_0001>
module attributes {stable_mosaic.version = 11 : i64} {
  func.func @_mlp_kernel(%arg0: i32, %arg1: memref<2x8xf32, #tpu.memory_space<vmem>>, %arg2: memref<8x128xf32, #tpu.memory_space<vmem>>, %arg3: memref<1x128xf32, #tpu.memory_space<vmem>>, %arg4: memref<128x32xf32, #tpu.memory_space<vmem>>, %arg5: memref<1x32xf32, #tpu.memory_space<vmem>>, %arg6: memref<2x32xf32, #tpu.memory_space<vmem>>) attributes {dimension_semantics = [#tpu.dimension_semantics<parallel>], iteration_bounds = array<i64: 1>, scalar_prefetch = 0 : i64, scratch_operands = 0 : i64, tpu.core_type = #tpu.core_type<tc>, window_params = [{transform_indices = @transform_0, window_bounds = array<i64: 2, 8>}, {pipeline_mode = #tpu.pipeline_mode<synchronous>, transform_indices = @transform_1, window_bounds = array<i64: 8, 128>}, {pipeline_mode = #tpu.pipeline_mode<synchronous>, transform_indices = @transform_2, window_bounds = array<i64: 1, 128>}, {pipeline_mode = #tpu.pipeline_mode<synchronous>, transform_indices = @transform_3, window_bounds = array<i64: 128, 32>}, {pipeline_mode = #tpu.pipeline_mode<synchronous>, transform_indices = @transform_4, window_bounds = array<i64: 1, 32>}, {transform_indices = @transform_5, window_bounds = array<i64: 2, 32>}]} {
    %c0 = arith.constant 0 : index
    %c0_0 = arith.constant 0 : index
    %0 = vector.load %arg1[%c0, %c0_0] : memref<2x8xf32, #tpu.memory_space<vmem>>, vector<2x8xf32>
    %c0_1 = arith.constant 0 : index
    %c0_2 = arith.constant 0 : index
    %1 = vector.load %arg2[%c0_1, %c0_2] : memref<8x128xf32, #tpu.memory_space<vmem>>, vector<8x128xf32>
    %cst = arith.constant dense<0.000000e+00> : vector<2x128xf32>
    %2 = tpu.matmul %0, %1, %cst {dimension_numbers = #tpu.dot_dimension_numbers<[1], [0], [0], [1], [0, 0, 1, 1], [], []>} : vector<2x8xf32>, vector<8x128xf32>, vector<2x128xf32> -> vector<2x128xf32>
    %c0_3 = arith.constant 0 : index
    %c0_4 = arith.constant 0 : index
    %3 = vector.load %arg3[%c0_3, %c0_4] : memref<1x128xf32, #tpu.memory_space<vmem>>, vector<1x128xf32>
    %4 = vector.broadcast %3 : vector<1x128xf32> to vector<2x128xf32>
    %5 = arith.addf %2, %4 : vector<2x128xf32>
    %cst_5 = arith.constant 0.000000e+00 : f32
    %6 = vector.broadcast %cst_5 : f32 to vector<2x128xf32>
    %7 = arith.maximumf %5, %6 : vector<2x128xf32>
    %c0_6 = arith.constant 0 : index
    %c0_7 = arith.constant 0 : index
    %8 = vector.load %arg4[%c0_6, %c0_7] : memref<128x32xf32, #tpu.memory_space<vmem>>, vector<128x32xf32>
    %cst_8 = arith.constant dense<0.000000e+00> : vector<2x32xf32>
    %9 = tpu.matmul %7, %8, %cst_8 {dimension_numbers = #tpu.dot_dimension_numbers<[1], [0], [0], [1], [0, 0, 1, 1], [], []>} : vector<2x128xf32>, vector<128x32xf32>, vector<2x32xf32> -> vector<2x32xf32>
    %c0_9 = arith.constant 0 : index
    %c0_10 = arith.constant 0 : index
    %10 = vector.load %arg5[%c0_9, %c0_10] : memref<1x32xf32, #tpu.memory_space<vmem>>, vector<1x32xf32>
    %11 = vector.broadcast %10 : vector<1x32xf32> to vector<2x32xf32>
    %12 = arith.addf %9, %11 : vector<2x32xf32>
    %cst_11 = arith.constant 0.000000e+00 : f32
    %13 = vector.broadcast %cst_11 : f32 to vector<2x32xf32>
    %14 = arith.maximumf %12, %13 : vector<2x32xf32>
    %c0_12 = arith.constant 0 : index
    %c0_13 = arith.constant 0 : index
    %15 = vector.load %arg6[%c0_12, %c0_13] : memref<2x32xf32, #tpu.memory_space<vmem>>, vector<2x32xf32>
    tpu.vector_store %arg6[%c0_12, %c0_13], %14 {strides = array<i32>} : memref<2x32xf32, #tpu.memory_space<vmem>>, vector<2x32xf32>,
    return
  }
  func.func @transform_0(%arg0: i32) -> (i32, i32) {
    %c0_i32 = arith.constant 0 : i32
    %c0_i32_0 = arith.constant 0 : i32
    return %arg0, %c0_i32 : i32, i32
  }
  func.func @transform_1(%arg0: i32) -> (i32, i32) {
    %c0_i32 = arith.constant 0 : i32
    %c0_i32_0 = arith.constant 0 : i32
    %c0_i32_1 = arith.constant 0 : i32
    return %c0_i32, %c0_i32_0 : i32, i32
  }
  func.func @transform_2(%arg0: i32) -> (i32, i32) {
    %c0_i32 = arith.constant 0 : i32
    %c0_i32_0 = arith.constant 0 : i32
    %c0_i32_1 = arith.constant 0 : i32
    return %c0_i32, %c0_i32_0 : i32, i32
  }
  func.func @transform_3(%arg0: i32) -> (i32, i32) {
    %c0_i32 = arith.constant 0 : i32
    %c0_i32_0 = arith.constant 0 : i32
    %c0_i32_1 = arith.constant 0 : i32
    return %c0_i32, %c0_i32_0 : i32, i32
  }
  func.func @transform_4(%arg0: i32) -> (i32, i32) {
    %c0_i32 = arith.constant 0 : i32
    %c0_i32_0 = arith.constant 0 : i32
    %c0_i32_1 = arith.constant 0 : i32
    return %c0_i32, %c0_i32_0 : i32, i32
  }
  func.func @transform_5(%arg0: i32) -> (i32, i32) {
    %c0_i32 = arith.constant 0 : i32
    %c0_i32_0 = arith.constant 0 : i32
    return %arg0, %c0_i32 : i32, i32
  }
}

</mosaic_0001>

<bundles_post_ra>
// kernel: tpu_custom_call.1
= control target key start
LH: loop header
LB: loop body
LE: loop exit
PB: predicated region body
PF: predicated region fallthrough
CT: control target
= control target key end

     0   :  { %vm30_vm0 = vcmask 64512   ;;  %v329_v2 = vmov 0.0   ;;  %vm330_vm1 = vmmov 0   ;;  %v331_v6 = vmov 0.0|0.0   ;;  %s435_s0 = inlined_call_operand.vmem [shape: f32[2,8], index: 0, kind: input, shape index: {}]   ;;  %s436_s1 = inlined_call_operand.vmem [shape: f32[8,128], index: 1, kind: input, shape index: {}]   ;;  %s437_s2 = inlined_call_operand.vmem [shape: f32[1,128], index: 2, kind: input, shape index: {}]   ;;  %s438_s3 = inlined_call_operand.vmem [shape: f32[128,32], index: 3, kind: input, shape index: {}]   ;;  %s439_s4 = inlined_call_operand.vmem [shape: f32[1,32], index: 4, kind: input, shape index: {}]   ;;  %s440_s5 = inlined_call_operand.hbm [shape: f32[2,32], index: 5, kind: output, shape index: {}]  }
   0x1   :  { %v22_v0 = vld [vmem:[%s436_s1] sm:$0xff]  ;;  %237 = vmatprep.subr.mxu0 %v329_v2  ;;  %239 = vmatprep.mubr.msk.f32.mxu0 %vm330_vm1, %v329_v2  ;;  %v106_v4 = vld [vmem:[%s438_s3 + $0x8] sm:$0xff]  ;;  %v107_v5 = vld [vmem:[%s438_s3 + $0x10] sm:$0xff] }
   0x2   :  { %v21_v1 = vld [vmem:[%s435_s0] sm:$0x3]  ;;  %238 = vmatpush3.msra.mxu0 %v22_v0  ;;  %277 = vmatprep.subr.bf16.mxu1 %v331_v6  ;;  %v108_v8 = vld [vmem:[%s438_s3 + $0x18] sm:$0xff]  ;;  %v110_v11 = vld [vmem:[%s438_s3 + $0x28] sm:$0xff] }
   0x3   :  { %v105_v3 = vld [vmem:[%s438_s3] sm:$0xff]  ;;  %240 = vmatmul.mubr.msk.f32.vlgmr.msra.gmra.mrb[0].mxu0 %vm30_vm0, %v21_v1  ;;  %274 = vmatprep.mubr.msk.f32.mxu1 %vm330_vm1, %v329_v2  ;;  %v281_v9 = vpack.c.bf16 %v108_v8, %v107_v5 }
   0x4   :  { %v278_v7 = vpack.c.bf16 %v106_v4, %v105_v3  ;;  %v109_v10 = vld [vmem:[%s438_s3 + $0x20] sm:$0xff] }
   0x6   :  { %279 = vmatpush3.bf16.msra.mxu1 %v278_v7 }
   0x7   :  { %280 = vmatprep.subr.bf16.mxu1 %v331_v6 }
   0x8   :  { %10 = vsyncpa [#allocation3], 0  ;;  %v284_v12 = vpack.c.bf16 %v110_v11, %v109_v10  ;;  %v111_v13 = vld [vmem:[%s438_s3 + $0x30] sm:$0xff]  ;;  %v112_v14 = vld [vmem:[%s438_s3 + $0x38] sm:$0xff]  ;;  %s332_s29 = smov [#allocation2]   ;;  %vm199_vm2 = vcmask 254976  }
   0x9   :  { %v287_v15 = vpack.c.bf16 %v112_v14, %v111_v13  ;;  %v113_v16 = vld [vmem:[%s438_s3 + $0x40] sm:$0xff]  ;;  %v114_v17 = vld [vmem:[%s438_s3 + $0x48] sm:$0xff]  ;;  %v115_v19 = vld [vmem:[%s438_s3 + $0x50] sm:$0xff]  ;;  %s207_s30 = sshll.u32 %s332_s29, 4  ;;  %s208_s30 = int_to_ptr.vmem [resolvable:$true] %s207_s30 }
   0xa   :  { %282 = vmatpush3.bf16.msra.mxu1 %v281_v9  ;;  %v290_v18 = vpack.c.bf16 %v114_v17, %v113_v16  ;;  %v116_v20 = vld [vmem:[%s438_s3 + $0x58] sm:$0xff]  ;;  %v117_v22 = vld [vmem:[%s438_s3 + $0x60] sm:$0xff]  ;;  %v118_v23 = vld [vmem:[%s438_s3 + $0x68] sm:$0xff]  ;;  %p310_p1 = scmp.lt.s32.totalorder %s208_s30, %s208_s30 }
   0xb   :  { %283 = vmatprep.subr.bf16.mxu1 %v331_v6  ;;  %v293_v21 = vpack.c.bf16 %v116_v20, %v115_v19  ;;  %v296_v24 = vpack.c.bf16 %v118_v23, %v117_v22  ;;  %v119_v25 = vld [vmem:[%s438_s3 + $0x70] sm:$0xff]  ;;  %v120_v26 = vld [vmem:[%s438_s3 + $0x78] sm:$0xff]  ;;  %v215_v28 = vld [vmem:[%s437_s2] ss:$0 sm:$0xff]  ;;  %s305_s3 = scalar_lea.vmem %s208_s30, 32 }
   0xc   :  { %v299_v27 = vpack.c.bf16 %v120_v26, %v119_v25  ;;  %v217_v33 = vld [vmem:[%s439_s4] ss:$0 sm:$0xff]  ;;  %p306_p0 = scmp.ne.s32.totalorder %s208_s30, %s305_s3  ;;  %p311_p2 = scmp.lt.s32.totalorder %s305_s3, %s305_s3 }
   0xe   :  { %285 = vmatpush3.bf16.msra.mxu1 %v284_v12  ;;  %p312_p3 = por %p311_p2, %p310_p1 }
   0xf   :  { %286 = vmatprep.subr.bf16.mxu1 %v331_v6 }
  0x10   :  { %p313_p4 = pnand %p312_p3, %p306_p0 }
  0x12   :  { %288 = vmatpush3.bf16.msra.mxu1 %v287_v15 }
  0x13   :  { %289 = vmatprep.subr.bf16.mxu1 %v331_v6 }
  0x16   :  { %291 = vmatpush3.bf16.msra.mxu1 %v290_v18 }
  0x17   :  { %292 = vmatprep.subr.bf16.mxu1 %v331_v6 }
  0x1a   :  { %294 = vmatpush3.bf16.msra.mxu1 %v293_v21 }
  0x1b   :  { %295 = vmatprep.subr.bf16.mxu1 %v331_v6 }
  0x1e   :  { %297 = vmatpush3.bf16.msra.mxu1 %v296_v24 }
  0x1f   :  { %298 = vmatprep.subr.bf16.mxu1 %v331_v6 }
  0x22   :  { %300 = vmatpush3.bf16.msra.mxu1 %v299_v27 }
  0xd6   :  { %v100_v29 = vpop.f32.mrb[0].mxu0 }
  0xd7   :  { %v101_v30 = vadd.f32 %v215_v28, %v100_v29  ;;  %v241_v31 = vpop.f32.mrb[1].mxu0 }
  0xd9   :  { %v104_v32 = vmax.f32 %v101_v30, 0.0 }
  0xdb   :  { %275 = vmatmul.mubr.f32.vlgmr.msra.gmra.mrb[0].mxu1 %v104_v32 }
 0x1ae   :  { %v194_v34 = vpop.f32.mrb[0].mxu1 }
 0x1af   :  { %v195_v35 = vadd.f32 %v217_v33, %v194_v34  ;;  %v276_v36 = vpop.f32.mrb[1].mxu1 }
 0x1b1   :  { %v198_v37 = vmax.f32 %v195_v35, 0.0 }
 0x1b3   :  { %200 = vst.msk [vmem:[#allocation2] sm:$0x3] %vm199_vm2, %v198_v37 }
 0x1b4   :  { %316 = shalt.err (!%p313_p4)
}
 0x1b5   :  { %s317_s4 = scalar_lea.hbm %s440_s5, 32 }
 0x1b6   :  { %p318_p5 = scmp.ne.s32.totalorder %s440_s5, %s317_s4  ;;  %p321_p6 = scmp.lt.u32.totalorder %s317_s4, %s440_s5 }
 0x1b8   :  { %p323_p7 = pnand %p321_p6, %p318_p5 }
 0x1ba   :  { %326 = shalt.err (!%p323_p7)
}
 0x1bb   :  { %210 = dma.vmem_to_hbm [thread:$0]  %s208_s30, 32, %s440_s5, [#allocation3]  }
 0x1bc   :  { %327 = dma.done.wait [#allocation3], 32  }
 0x1bd   :  { %328 = vsyncadd [#allocation3], 4294967264 }
 0x1be   :  { %214 = vsyncpa [#allocation3], 1 }

</bundles_post_ra>
